<compile_context>
chip_gen: v7x
topology: tpu7x:2x2x1
jax: 0.10.0
libtpu: 0.0.40
codegen_flags: <defaults>
</compile_context>

<pallas_src>
from functools import partial

import jax
import jax.numpy as jnp
from jax.experimental import pallas as pl
from jax.experimental.pallas import tpu as pltpu


def pinn_mlp_kernel(x_ref, *refs):
    """refs = (w0, b0, w1, b1, ..., wL, bL, out_ref).

    Feature-major: x_ref is (din, tile_n), out_ref is (dout, tile_n),
    weights are PyTorch-shaped (d_out_i, d_in_i), biases are (d_out_i, 1).
    """
    out_ref = refs[-1]
    wb = refs[:-1]
    n_layers = len(wb) // 2

    x = x_ref[...].astype(jnp.float32)            # (din, tile_n), lane-dense

    # ---- Layer 0 (normalization already folded into w0/b0 on the host) ----
    w0 = wb[0][...]                               # (h0, din)
    b0 = wb[1][...]                               # (h0, 1)
    din = w0.shape[1]
    if din <= 8:
        # Tiny contraction: unrolled lane-broadcast FMAs on the VPU (exact f32);
        # avoids a K-padded MXU push for almost no useful work.
        h = b0 + w0[:, 0:1] * x[0:1, :]
        for j in range(1, din):
            h = h + w0[:, j:j + 1] * x[j:j + 1, :]
    else:
        h = jnp.dot(w0, x, preferred_element_type=jnp.float32,
                    precision=jax.lax.Precision.HIGHEST) + b0
    if n_layers > 1:
        h = jnp.tanh(h)

    # ---- Remaining layers: full-f32 MXU matmuls, lane-dense (d, tile_n) ----
    for i in range(1, n_layers):
        w = wb[2 * i][...]                        # (d_out_i, d_in_i)
        b = wb[2 * i + 1][...]                    # (d_out_i, 1)
        h = jnp.dot(w, h, preferred_element_type=jnp.float32,
                    precision=jax.lax.Precision.HIGHEST) + b
        if i < n_layers - 1:                      # tanh on all but the last layer
            h = jnp.tanh(h)

    out_ref[...] = h.astype(out_ref.dtype)


@partial(jax.jit, static_argnames=("tile_n", "use_core_parallel"))
def pinn_mlp_forward(x, lb, ub, weights, biases, *,
                     tile_n=None, use_core_parallel=False):
    """PINN MLP forward pass via a single Pallas TPU kernel.

    x:       (N, in_dim) float32 (PyTorch layout)
    lb, ub:  (in_dim,) float32
    weights: list of PyTorch-shaped (d_out_i, d_in_i) float32
    biases:  list of (d_out_i,) float32
    tile_n:  batch tile (multiple of 128); None = adaptive (single grid step
             for N <= 8192, fat 8192 tiles above that).
    use_core_parallel: on v7x with >=2 batch tiles, shard the batch grid axis
             across both TensorCores (pltpu.CORE_PARALLEL).
    Returns: (N, d_out_last) float32
    """
    N, din = x.shape
    dout = weights[-1].shape[0]

    # ---- Adaptive batch tiling (grid steps are sequential on 1-TC chips) ----
    n_pad128 = pl.cdiv(N, 128) * 128
    if tile_n is None:
        tile_n = n_pad128 if n_pad128 <= 8192 else 8192
    else:
        tile_n = max(128, (int(tile_n) // 128) * 128)
        tile_n = min(tile_n, n_pad128)
    n_pad = pl.cdiv(N, tile_n) * tile_n
    num_tiles = n_pad // tile_n

    if n_pad != N:
        x = jnp.pad(x, ((0, n_pad - N), (0, 0)))

    # ---- Fold the [-1, 1] normalization into layer 0 (inside this jit) ----
    #   x_norm = scale * x + shift, scale = 2/(ub-lb), shift = -2*lb/(ub-lb)-1
    #   => W0' = W0 * scale (per input column), b0' = b0 + W0 @ shift
    lb = lb.astype(jnp.float32)
    ub = ub.astype(jnp.float32)
    scale = 2.0 / (ub - lb)
    shift = -2.0 * lb / (ub - lb) - 1.0
    w0 = weights[0].astype(jnp.float32)
    folded_w = [w0 * scale[None, :]] + [w.astype(jnp.float32) for w in weights[1:]]
    b0f = biases[0].astype(jnp.float32) + jnp.dot(
        w0, shift, precision=jax.lax.Precision.HIGHEST)
    folded_b = [b0f] + [b.astype(jnp.float32) for b in biases[1:]]

    # Feature-major input: (din, n_pad).  The transpose / pad / output slice
    # are all inside this jit, so they fuse with the pallas_call instead of
    # being separate dispatches with HBM round trips.
    x_fm = x.astype(jnp.float32).T

    in_specs = [pl.BlockSpec((din, tile_n), lambda i: (0, i))]     # x tile
    args = [x_fm]
    for w, b in zip(folded_w, folded_b):
        # Full-array blocks for the tiny weights/biases — VMEM-resident; the
        # constant index_map means Pallas never re-DMAs them across steps.
        # TODO(synk): for deep PINN configs (6-8 hidden layers) pack all
        # weights/biases into one flat buffer to cut per-argument DMA overhead.
        in_specs.append(pl.BlockSpec(w.shape, lambda i: (0, 0)))
        in_specs.append(pl.BlockSpec((w.shape[0], 1), lambda i: (0, 0)))
        args.append(w)
        args.append(b.reshape(-1, 1))

    out_specs = pl.BlockSpec((dout, tile_n), lambda i: (0, i))

    # Single step -> plain sequential; multi-step -> parallel (or v7x
    # CORE_PARALLEL so both TensorCores get batch tiles).
    if num_tiles > 1:
        dim_sem = (pltpu.CORE_PARALLEL,) if use_core_parallel else ("parallel",)
    else:
        dim_sem = ("arbitrary",)

    cp_kwargs = dict(dimension_semantics=dim_sem)
    if tile_n > 16384:
        # Very fat tiles: v5e's 16 MiB scoped-VMEM default is the first ceiling.
        max_w = max(int(w.shape[0]) for w in folded_w)
        est = 4 * tile_n * (2 * (din + dout) + 6 * max_w)
        cp_kwargs["vmem_limit_bytes"] = int(min(2 * est, 100 * 1024 * 1024))

    out_fm = pl.pallas_call(
        pinn_mlp_kernel,
        out_shape=jax.ShapeDtypeStruct((dout, n_pad), jnp.float32),
        grid_spec=pltpu.PrefetchScalarGridSpec(
            num_scalar_prefetch=0,
            grid=(num_tiles,),
            in_specs=in_specs,
            out_specs=out_specs,
        ),
        compiler_params=pltpu.CompilerParams(**cp_kwargs),
    )(*args)

    # Padded batch rows hold garbage (b0'-propagated) activations; slice off.
    return out_fm[:, :N].T


def reference_forward(x, lb, ub, weights, biases):
    """Pure-JAX reference (PyTorch semantics, PyTorch-shaped weights)."""
    h = 2.0 * (x - lb) / (ub - lb) - 1.0
    for i, (w, b) in enumerate(zip(weights, biases)):
        h = jnp.dot(h, w.T, precision=jax.lax.Precision.HIGHEST) + b
        if i < len(weights) - 1:
            h = jnp.tanh(h)
    return h


if __name__ == "__main__":
    # Module config consistent with PINN_MLP: layers = [2, 32, 32, 3]
    # ((x, y) -> (u, v, p)). mu, rho, domain only matter in net_f, not forward.
    layers = [2, 32, 32, 3]
    N = 256                  # small collocation batch -> single grid step

    key = jax.random.PRNGKey(0)
    key, kx = jax.random.split(key)

    lb = jnp.array([-1.5, -0.5], dtype=jnp.float32)
    ub = jnp.array([2.5, 3.5], dtype=jnp.float32)

    # Deterministic synthetic parameters in native PyTorch (out, in) shape.
    weights, biases = [], []
    for i in range(len(layers) - 1):
        key, kw, kb = jax.random.split(key, 3)
        fan_in = layers[i]
        bound = 1.0 / (fan_in ** 0.5)
        w = jax.random.uniform(kw, (layers[i + 1], layers[i]),
                               minval=-bound, maxval=bound, dtype=jnp.float32)
        b = jax.random.uniform(kb, (layers[i + 1],),
                               minval=-bound, maxval=bound, dtype=jnp.float32)
        weights.append(w)
        biases.append(b)

    # Example collocation points inside [lb, ub].
    x = jax.random.uniform(kx, (N, layers[0]),
                           minval=lb, maxval=ub, dtype=jnp.float32)

    out = pinn_mlp_forward(x, lb, ub, weights, biases)
    out = jax.block_until_ready(out)

    ref = reference_forward(x, lb, ub, weights, biases)
    assert out.shape == (N, layers[-1])
    # 1e-4 tolerance: folding the normalization into W0/b0 reassociates f32 ops.
    assert jnp.allclose(out, ref, atol=1e-4, rtol=1e-4), "mismatch vs reference"

    # TODO(synk): net_f / net_uvp (PDE residuals via torch.autograd.grad) map to
    # jax.grad / jax.jacfwd around this jitted wrapper, not to in-kernel ops;
    # only forward() is implemented as a Pallas kernel.

    print("KERNEL_OK")
</pallas_src>

<mosaic_0001>
module attributes {stable_mosaic.version = 11 : i64} {
  func.func @pinn_mlp_kernel(%arg0: i32, %arg1: memref<2x256xf32, #tpu.memory_space<vmem>>, %arg2: memref<32x2xf32, #tpu.memory_space<vmem>>, %arg3: memref<32x1xf32, #tpu.memory_space<vmem>>, %arg4: memref<32x32xf32, #tpu.memory_space<vmem>>, %arg5: memref<32x1xf32, #tpu.memory_space<vmem>>, %arg6: memref<3x32xf32, #tpu.memory_space<vmem>>, %arg7: memref<3x1xf32, #tpu.memory_space<vmem>>, %arg8: memref<3x256xf32, #tpu.memory_space<vmem>>) attributes {dimension_semantics = [#tpu.dimension_semantics<arbitrary>], iteration_bounds = array<i64: 1>, scalar_prefetch = 0 : i64, scratch_operands = 0 : i64, tpu.core_type = #tpu.core_type<tc>, window_params = [{transform_indices = @transform_0, window_bounds = array<i64: 2, 256>}, {pipeline_mode = #tpu.pipeline_mode<synchronous>, transform_indices = @transform_1, window_bounds = array<i64: 32, 2>}, {pipeline_mode = #tpu.pipeline_mode<synchronous>, transform_indices = @transform_2, window_bounds = array<i64: 32, 1>}, {pipeline_mode = #tpu.pipeline_mode<synchronous>, transform_indices = @transform_3, window_bounds = array<i64: 32, 32>}, {pipeline_mode = #tpu.pipeline_mode<synchronous>, transform_indices = @transform_4, window_bounds = array<i64: 32, 1>}, {pipeline_mode = #tpu.pipeline_mode<synchronous>, transform_indices = @transform_5, window_bounds = array<i64: 3, 32>}, {pipeline_mode = #tpu.pipeline_mode<synchronous>, transform_indices = @transform_6, window_bounds = array<i64: 3, 1>}, {transform_indices = @transform_7, window_bounds = array<i64: 3, 256>}]} {
    %c0 = arith.constant 0 : index
    %c0_0 = arith.constant 0 : index
    %0 = vector.load %arg1[%c0, %c0_0] : memref<2x256xf32, #tpu.memory_space<vmem>>, vector<2x256xf32>
    %c0_1 = arith.constant 0 : index
    %c0_2 = arith.constant 0 : index
    %1 = vector.load %arg2[%c0_1, %c0_2] : memref<32x2xf32, #tpu.memory_space<vmem>>, vector<32x2xf32>
    %c0_3 = arith.constant 0 : index
    %c0_4 = arith.constant 0 : index
    %2 = vector.load %arg3[%c0_3, %c0_4] : memref<32x1xf32, #tpu.memory_space<vmem>>, vector<32x1xf32>
    %3 = vector.extract_strided_slice %1 {offsets = [0, 0], sizes = [32, 1], strides = [1, 1]} : vector<32x2xf32> to vector<32x1xf32>
    %4 = vector.extract_strided_slice %0 {offsets = [0, 0], sizes = [1, 256], strides = [1, 1]} : vector<2x256xf32> to vector<1x256xf32>
    %5 = vector.broadcast %3 : vector<32x1xf32> to vector<32x256xf32>
    %6 = vector.broadcast %4 : vector<1x256xf32> to vector<32x256xf32>
    %7 = arith.mulf %5, %6 : vector<32x256xf32>
    %8 = vector.broadcast %2 : vector<32x1xf32> to vector<32x256xf32>
    %9 = arith.addf %8, %7 : vector<32x256xf32>
    %10 = vector.extract_strided_slice %1 {offsets = [0, 1], sizes = [32, 1], strides = [1, 1]} : vector<32x2xf32> to vector<32x1xf32>
    %11 = vector.extract_strided_slice %0 {offsets = [1, 0], sizes = [1, 256], strides = [1, 1]} : vector<2x256xf32> to vector<1x256xf32>
    %12 = vector.broadcast %10 : vector<32x1xf32> to vector<32x256xf32>
    %13 = vector.broadcast %11 : vector<1x256xf32> to vector<32x256xf32>
    %14 = arith.mulf %12, %13 : vector<32x256xf32>
    %15 = arith.addf %9, %14 : vector<32x256xf32>
    %16 = math.tanh %15 : vector<32x256xf32>
    %c0_5 = arith.constant 0 : index
    %c0_6 = arith.constant 0 : index
    %17 = vector.load %arg4[%c0_5, %c0_6] : memref<32x32xf32, #tpu.memory_space<vmem>>, vector<32x32xf32>
    %c0_7 = arith.constant 0 : index
    %c0_8 = arith.constant 0 : index
    %18 = vector.load %arg5[%c0_7, %c0_8] : memref<32x1xf32, #tpu.memory_space<vmem>>, vector<32x1xf32>
    %cst = arith.constant dense<0.000000e+00> : vector<32x256xf32>
    %19 = tpu.matmul %17, %16, %cst {dimension_numbers = #tpu.dot_dimension_numbers<[1], [0], [0], [1], [0, 0, 1, 1], [], []>, precision = #tpu.contract_precision<fp32>} : vector<32x32xf32>, vector<32x256xf32>, vector<32x256xf32> -> vector<32x256xf32>
    %20 = vector.broadcast %18 : vector<32x1xf32> to vector<32x256xf32>
    %21 = arith.addf %19, %20 : vector<32x256xf32>
    %22 = math.tanh %21 : vector<32x256xf32>
    %c0_9 = arith.constant 0 : index
    %c0_10 = arith.constant 0 : index
    %23 = vector.load %arg6[%c0_9, %c0_10] : memref<3x32xf32, #tpu.memory_space<vmem>>, vector<3x32xf32>
    %c0_11 = arith.constant 0 : index
    %c0_12 = arith.constant 0 : index
    %24 = vector.load %arg7[%c0_11, %c0_12] : memref<3x1xf32, #tpu.memory_space<vmem>>, vector<3x1xf32>
    %cst_13 = arith.constant dense<0.000000e+00> : vector<3x256xf32>
    %25 = tpu.matmul %23, %22, %cst_13 {dimension_numbers = #tpu.dot_dimension_numbers<[1], [0], [0], [1], [0, 0, 1, 1], [], []>, precision = #tpu.contract_precision<fp32>} : vector<3x32xf32>, vector<32x256xf32>, vector<3x256xf32> -> vector<3x256xf32>
    %26 = vector.broadcast %24 : vector<3x1xf32> to vector<3x256xf32>
    %27 = arith.addf %25, %26 : vector<3x256xf32>
    %c0_14 = arith.constant 0 : index
    %c0_15 = arith.constant 0 : index
    %28 = vector.load %arg8[%c0_14, %c0_15] : memref<3x256xf32, #tpu.memory_space<vmem>>, vector<3x256xf32>
    tpu.vector_store %arg8[%c0_14, %c0_15], %27 {strides = array<i32>} : memref<3x256xf32, #tpu.memory_space<vmem>>, vector<3x256xf32>,
    return
  }
  func.func @transform_0(%arg0: i32) -> (i32, i32) {
    %c0_i32 = arith.constant 0 : i32
    %c0_i32_0 = arith.constant 0 : i32
    return %c0_i32, %arg0 : i32, i32
  }
  func.func @transform_1(%arg0: i32) -> (i32, i32) {
    %c0_i32 = arith.constant 0 : i32
    %c0_i32_0 = arith.constant 0 : i32
    %c0_i32_1 = arith.constant 0 : i32
    return %c0_i32, %c0_i32_0 : i32, i32
  }
  func.func @transform_2(%arg0: i32) -> (i32, i32) {
    %c0_i32 = arith.constant 0 : i32
    %c0_i32_0 = arith.constant 0 : i32
    %c0_i32_1 = arith.constant 0 : i32
    return %c0_i32, %c0_i32_0 : i32, i32
  }
  func.func @transform_3(%arg0: i32) -> (i32, i32) {
    %c0_i32 = arith.constant 0 : i32
    %c0_i32_0 = arith.constant 0 : i32
    %c0_i32_1 = arith.constant 0 : i32
    return %c0_i32, %c0_i32_0 : i32, i32
  }
  func.func @transform_4(%arg0: i32) -> (i32, i32) {
    %c0_i32 = arith.constant 0 : i32
    %c0_i32_0 = arith.constant 0 : i32
    %c0_i32_1 = arith.constant 0 : i32
    return %c0_i32, %c0_i32_0 : i32, i32
  }
  func.func @transform_5(%arg0: i32) -> (i32, i32) {
    %c0_i32 = arith.constant 0 : i32
    %c0_i32_0 = arith.constant 0 : i32
    %c0_i32_1 = arith.constant 0 : i32
    return %c0_i32, %c0_i32_0 : i32, i32
  }
  func.func @transform_6(%arg0: i32) -> (i32, i32) {
    %c0_i32 = arith.constant 0 : i32
    %c0_i32_0 = arith.constant 0 : i32
    %c0_i32_1 = arith.constant 0 : i32
    return %c0_i32, %c0_i32_0 : i32, i32
  }
  func.func @transform_7(%arg0: i32) -> (i32, i32) {
    %c0_i32 = arith.constant 0 : i32
    %c0_i32_0 = arith.constant 0 : i32
    return %c0_i32, %arg0 : i32, i32
  }
}

</mosaic_0001>

<bundles_post_ra>
// kernel: pinn_mlp_forward.1
= control target key start
LH: loop header
LB: loop body
LE: loop exit
PB: predicated region body
PF: predicated region fallthrough
CT: control target
= control target key end

     0   :  { %v1708_v2 = vmov 0   ;;  %s2035_s0 = inlined_call_operand.vmem [shape: f32[2,256], index: 0, kind: input, shape index: {}]   ;;  %s2036_s1 = inlined_call_operand.vmem [shape: f32[32,2], index: 1, kind: input, shape index: {}]   ;;  %s2037_s2 = inlined_call_operand.vmem [shape: f32[32,1], index: 2, kind: input, shape index: {}]   ;;  %s2038_s3 = inlined_call_operand.vmem [shape: f32[32,32], index: 3, kind: input, shape index: {}]   ;;  %s2039_s4 = inlined_call_operand.vmem [shape: f32[32,1], index: 4, kind: input, shape index: {}]   ;;  %s2040_s5 = inlined_call_operand.vmem [shape: f32[3,32], index: 5, kind: input, shape index: {}]   ;;  %s2041_s6 = inlined_call_operand.vmem [shape: f32[3,1], index: 6, kind: input, shape index: {}]   ;;  %s2042_s7 = inlined_call_operand.hbm [shape: f32[3,256], index: 7, kind: output, shape index: {}]  }
   0x1   :  { %v32_v0 = vld [vmem:[%s2037_s2] sm:$0xff]  ;;  %1645 = vset.pattern.permute.xlu1 %v1708_v2  ;;  %1644 = vset.pattern.permute.xlu0 %v1708_v2  ;;  %v33_v3 = vld [vmem:[%s2037_s2 + $0x8] sm:$0xff] }
   0x2   :  { %v28_v1 = vld [vmem:[%s2036_s1] sm:$0xff]  ;;  %85 = vperm.xlu1 %1645, %v32_v0   ;;  %v29_v4 = vld [vmem:[%s2036_s1 + $0x8] sm:$0xff] }
   0x3   :  { %38 = vperm.xlu0 %1644, %v28_v1  }
   0x4   :  { %12 = vsyncpa [#allocation3], 0  ;;  %v31_v5 = vld [vmem:[%s2036_s1 + $0x18] sm:$0xff]  ;;  %v1709_v6 = vmov 1   ;;  %v30_v7 = vld [vmem:[%s2036_s1 + $0x10] sm:$0xff]  ;;  %v1710_v10 = vmov 0.0   ;;  %v57_v11 = vlaneseq }
   0x5   :  { %v34_v8 = vld [vmem:[%s2037_s2 + $0x10] sm:$0xff]  ;;  %v35_v9 = vld [vmem:[%s2037_s2 + $0x18] sm:$0xff]  ;;  %282 = vmatprep.mubr.f32.mxu1 %v1710_v10  ;;  %431 = vmatprep.mubr.f32.mxu0 %v1710_v10  ;;  %v27_v15 = vld [vmem:[%s2035_s0] sm:$0xf]  ;;  %vm197_vm0 = vcmask 261120  }
   0x6   :  { %90 = vperm.xlu1 %1645, %v33_v3   ;;  %v58_v12 = vshrl.u32 %v57_v11, 7  ;;  %v173_v22 = vld [vmem:[%s2039_s4] sm:$0xff]  ;;  %v174_v23 = vld [vmem:[%s2039_s4 + $0x8] sm:$0xff]  ;;  %v175_v26 = vld [vmem:[%s2039_s4 + $0x10] sm:$0xff] }
   0x7   :  { %43 = vperm.xlu0 %1644, %v29_v4   ;;  %v909_v27 = vld [vmem:[%s2041_s6] sm:$0x7]  ;;  %v176_v36 = vld [vmem:[%s2039_s4 + $0x18] sm:$0xff] }
   0x8   :  { %v59_v13 = vsub.s32 0, %v58_v12  ;;  %v63_v14 = vsub.s32 2, %v58_v12  ;;  %v129_v16 = vsub.s32 1, %v58_v12  ;;  %v133_v17 = vsub.s32 3, %v58_v12 }
   0xa   :  { %1646 = vset.pattern.permute.xlu1 %v1709_v6  ;;  %v60_v20 = vrot.slane %v27_v15, %v59_v13  ;;  %v64_v21 = vrot.slane %v27_v15, %v63_v14  ;;  %v130_v24 = vrot.slane %v27_v15, %v129_v16  ;;  %v134_v25 = vrot.slane %v27_v15, %v133_v17 }
   0xb   :  { %53 = vperm.xlu0 %1644, %v31_v5   ;;  %116 = vperm.xlu1 %1646, %v29_v4  }
   0xc   :  { %v70_v28 = vrot.slane %v60_v20, %v59_v13  ;;  %v74_v29 = vrot.slane %v64_v21, %v59_v13  ;;  %v140_v34 = vrot.slane %v130_v24, %v129_v16  ;;  %v144_v35 = vrot.slane %v134_v25, %v129_v16 }
   0xf   :  { %1648 = vset.pattern.permute.xlu0 %v1709_v6  ;;  %1647 = vset.pattern.permute.xlu1 %v1708_v2 }
  0x10   :  { %112 = vperm.xlu0 %1648, %v28_v1   ;;  %48 = vperm.xlu1 %1647, %v30_v7  }
  0x14   :  { %120 = vperm.xlu0 %1648, %v30_v7   ;;  %95 = vperm.xlu1 %1647, %v34_v8   ;;  %v169_v8 = vld [vmem:[%s2038_s3] sm:$0xff] }
  0x15   :  { %v199_v21 = vsel %vm197_vm0, %v169_v8, 0 }
  0x18   :  { %1651 = vset.pattern.permute.xlu0 %v1708_v2  ;;  %100 = vperm.xlu1 %1647, %v35_v9  }
  0x19   :  { %184 = vperm.xlu0 %1651, %v174_v23  }
  0x1c   :  { %1649 = vset.pattern.permute.xlu1 %v1709_v6 }
  0x1d   :  { %124 = vperm.xlu1 %1649, %v31_v5   ;;  %912 = vperm.xlu0 %1651, %v909_v27  }
  0x21   :  { %1650 = vset.pattern.permute.xlu1 %v1708_v2 }
  0x22   :  { %179 = vperm.xlu1 %1650, %v173_v22  }
  0x26   :  { %189 = vperm.xlu1 %1650, %v175_v26  }
  0x2a   :  { %194 = vperm.xlu1 %1650, %v176_v36  }
  0x81   :  { %v86_v18 = vpop.permute.xlu1 %85 }
  0x82   :  { %v39_v19 = vpop.permute.xlu0 %38 }
  0x83   :  { %v75_v38 = vmul.f32 %v70_v28, %v39_v19  ;;  %v76_v39 = vmul.f32 %v74_v29, %v39_v19 }
  0x85   :  { %v91_v30 = vpop.permute.xlu1 %90  ;;  %v103_v47 = vadd.f32 %v86_v18, %v75_v38  ;;  %v104_v49 = vadd.f32 %v86_v18, %v76_v39 }
  0x86   :  { %v44_v31 = vpop.permute.xlu0 %43 }
  0x87   :  { %v77_v32 = vmul.f32 %v70_v28, %v44_v31  ;;  %v78_v33 = vmul.f32 %v74_v29, %v44_v31 }
  0x89   :  { %v105_v41 = vadd.f32 %v91_v30, %v77_v32  ;;  %v106_v42 = vadd.f32 %v91_v30, %v78_v33  ;;  %v1814_v30 = vand.u32 4294901760, %v199_v21 }
  0x8a   :  { %v54_v37 = vpop.permute.xlu0 %53  ;;  %v117_v40 = vpop.permute.xlu1 %116 }
  0x8b   :  { %v147_v43 = vmul.f32 %v140_v34, %v117_v40  ;;  %v148_v44 = vmul.f32 %v144_v35, %v117_v40  ;;  %v81_v4 = vmul.f32 %v70_v28, %v54_v37  ;;  %v82_v6 = vmul.f32 %v74_v29, %v54_v37 }
  0x8d   :  { %v155_v45 = vadd.f32 %v147_v43, %v105_v41  ;;  %v156_v46 = vadd.f32 %v148_v44, %v106_v42  ;;  %v1833_v41 = vsub.f32 %v199_v21, %v1814_v30 }
  0x8f   :  { %v113_v48 = vpop.permute.xlu0 %112  ;;  %1652 = vtanh.f32 %v155_v45  ;;  %v49_v52 = vpop.permute.xlu1 %48 }
  0x90   :  { %v145_v50 = vmul.f32 %v140_v34, %v113_v48  ;;  %v146_v51 = vmul.f32 %v144_v35, %v113_v48  ;;  %1654 = vtanh.f32 %v156_v46  ;;  %v79_v55 = vmul.f32 %v70_v28, %v49_v52  ;;  %v170_v46 = vld [vmem:[%s2038_s3 + $0x8] sm:$0xff] }
  0x91   :  { %v80_v56 = vmul.f32 %v74_v29, %v49_v52  ;;  %v171_v52 = vld [vmem:[%s2038_s3 + $0x10] sm:$0xff] }
  0x92   :  { %v153_v53 = vadd.f32 %v145_v50, %v103_v47  ;;  %v154_v54 = vadd.f32 %v146_v51, %v104_v49  ;;  %v285_v51 = vand.u32 4294901760, %v1833_v41 }
  0x93   :  { %v121_v57 = vpop.permute.xlu0 %120  ;;  %v96_v58 = vpop.permute.xlu1 %95 }
  0x94   :  { %1656 = vtanh.f32 %v153_v53  ;;  %v149_v59 = vmul.f32 %v140_v34, %v121_v57  ;;  %v150_v60 = vmul.f32 %v144_v35, %v121_v57  ;;  %v107_v61 = vadd.f32 %v96_v58, %v79_v55 }
  0x95   :  { %1658 = vtanh.f32 %v154_v54  ;;  %v108_v62 = vadd.f32 %v96_v58, %v80_v56  ;;  %v202_v53 = vsel %vm197_vm0, %v170_v46, 0  ;;  %v205_v58 = vsel %vm197_vm0, %v171_v52, 0 }
  0x96   :  { %v157_v63 = vadd.f32 %v149_v59, %v107_v61 }
  0x97   :  { %v158_v0 = vadd.f32 %v150_v60, %v108_v62  ;;  %v101_v1 = vpop.permute.xlu1 %100  ;;  %v286_v60 = vsub.f32 %v1833_v41, %v285_v51  ;;  %v1853_v62 = vand.u32 4294901760, %v202_v53 }
  0x98   :  { %1660 = vtanh.f32 %v157_v63  ;;  %v109_v9 = vadd.f32 %v101_v1, %v81_v4  ;;  %v110_v14 = vadd.f32 %v101_v1, %v82_v6  ;;  %v172_v63 = vld [vmem:[%s2038_s3 + $0x18] sm:$0xff] }
  0x99   :  { %v1653_v2 = vpop.eup %1652  ;;  %1662 = vtanh.f32 %v158_v0  ;;  %v1867_v4 = vsub.f32 %v202_v53, %v1853_v62  ;;  %v208_v8 = vsel %vm197_vm0, %v172_v63, 0 }
  0x9a   :  { %v1655_v3 = vpop.eup %1654  ;;  %v216_v5 = vand.u32 4294901760, %v1653_v2 }
  0x9b   :  { %v214_v7 = vand.u32 4294901760, %v1655_v3 }
  0x9c   :  { %v125_v11 = vpop.permute.xlu1 %124  ;;  %v1799_v12 = vsub.f32 %v1653_v2, %v216_v5 }
  0x9d   :  { %v151_v15 = vmul.f32 %v140_v34, %v125_v11  ;;  %v152_v16 = vmul.f32 %v144_v35, %v125_v11  ;;  %v1801_v17 = vsub.f32 %v1655_v3, %v214_v7 }
  0x9e   :  { %v1657_v13 = vpop.eup %1656  ;;  %v347_v20 = vand.u32 4294901760, %v1799_v12 }
  0x9f   :  { %v1659_v18 = vpop.eup %1658  ;;  %v212_v19 = vand.u32 4294901760, %v1657_v13  ;;  %v159_v22 = vadd.f32 %v151_v15, %v109_v9  ;;  %v160_v23 = vadd.f32 %v152_v16, %v110_v14  ;;  %v341_v25 = vand.u32 4294901760, %v1801_v17 }
  0xa0   :  { %v210_v24 = vand.u32 4294901760, %v1659_v18  ;;  %v348_v33 = vsub.f32 %v1799_v12, %v347_v20  ;;  %v287_v9 = vand.u32 4294901760, %v286_v60  ;;  %v296_v14 = vand.u32 4294901760, %v1867_v4 }
  0xa1   :  { %v1806_v26 = vpack.c.bf16 %v216_v5, %v212_v19  ;;  %v1808_v27 = vsub.f32 %v1657_v13, %v212_v19  ;;  %1664 = vtanh.f32 %v159_v22  ;;  %v342_v36 = vsub.f32 %v1801_v17, %v341_v25 }
  0xa2   :  { %v1810_v28 = vpack.c.bf16 %v214_v7, %v210_v24  ;;  %v1812_v29 = vsub.f32 %v1659_v18, %v210_v24  ;;  %v1661_v31 = vpop.eup %1660  ;;  %1666 = vtanh.f32 %v160_v23  ;;  %v349_v43 = vand.u32 4294901760, %v348_v33 }
  0xa3   :  { %v335_v32 = vand.u32 4294901760, %v1808_v27  ;;  %v1663_v34 = vpop.eup %1662  ;;  %v220_v38 = vand.u32 4294901760, %v1661_v31  ;;  %v343_v45 = vand.u32 4294901760, %v342_v36  ;;  %v1869_v5 = vand.u32 4294901760, %v205_v58 }
  0xa4   :  { %1481 = vmatprep.subr.bf16.mxu1 %v1810_v28  ;;  %v329_v35 = vand.u32 4294901760, %v1812_v29  ;;  %v218_v40 = vand.u32 4294901760, %v1663_v34  ;;  %v1892_v19 = vand.u32 4294901760, %v208_v8  ;;  %v297_v21 = vsub.f32 %v1867_v4, %v296_v14 }
  0xa5   :  { %1483 = vmatpush1.bf16.msra.mxu1 %v1806_v26  ;;  %v336_v37 = vsub.f32 %v1808_v27, %v335_v32  ;;  %v1838_v48 = vsub.f32 %v1661_v31, %v220_v38  ;;  %v1890_v18 = vsub.f32 %v205_v58, %v1869_v5 }
  0xa6   :  { %v330_v39 = vsub.f32 %v1812_v29, %v329_v35  ;;  %v1840_v50 = vsub.f32 %v1663_v34, %v218_v40  ;;  %v1512_v52 = vpack.c.bf16 %v341_v25, %v329_v35 }
  0xa7   :  { %v337_v42 = vand.u32 4294901760, %v336_v37  ;;  %v359_v57 = vand.u32 4294901760, %v1838_v48  ;;  %v307_v33 = vand.u32 4294901760, %v1890_v18  ;;  %v317_v37 = vsub.f32 %v208_v8, %v1892_v19 }
  0xa8   :  { %v331_v44 = vand.u32 4294901760, %v330_v39  ;;  %v353_v61 = vand.u32 4294901760, %v1840_v50 }
  0xa9   :  { %v1490_v47 = vpack.c.bf16 %v349_v43, %v337_v42  ;;  %v360_v6 = vsub.f32 %v1838_v48, %v359_v57  ;;  %v308_v39 = vsub.f32 %v1890_v18, %v307_v33  ;;  %v318_v42 = vand.u32 4294901760, %v317_v37 }
  0xaa   :  { %v1488_v49 = vpack.c.bf16 %v343_v45, %v331_v44  ;;  %v354_v11 = vsub.f32 %v1840_v50, %v353_v61  ;;  %v1498_v45 = vpack.c.bf16 %v1799_v12, %v1808_v27 }
  0xab   :  { %v1665_v54 = vpop.eup %1664  ;;  %v361_v22 = vand.u32 4294901760, %v360_v6  ;;  %v309_v43 = vand.u32 4294901760, %v308_v39  ;;  %v319_v44 = vsub.f32 %v317_v37, %v318_v42 }
  0xac   :  { %1489 = vmatprep.subr.bf16.mxu0 %v1488_v49  ;;  %v1667_v55 = vpop.eup %1666  ;;  %v224_v56 = vand.u32 4294901760, %v1665_v54  ;;  %v355_v24 = vand.u32 4294901760, %v354_v11 }
  0xad   :  { %1491 = vmatpush1.bf16.msra.mxu0 %v1490_v47  ;;  %v222_v59 = vand.u32 4294901760, %v1667_v55 }
  0xae   :  { %v1858_v0 = vpack.c.bf16 %v224_v56, %v220_v38  ;;  %v1860_v1 = vsub.f32 %v1665_v54, %v224_v56  ;;  %v298_v38 = vand.u32 4294901760, %v297_v21 }
  0xaf   :  { %v1862_v2 = vpack.c.bf16 %v222_v59, %v218_v40  ;;  %v1864_v3 = vsub.f32 %v1667_v55, %v222_v59  ;;  %v1496_v40 = vpack.c.bf16 %v1801_v17, %v1812_v29  ;;  %v1514_v17 = vpack.c.bf16 %v347_v20, %v335_v32 }
  0xb0   :  { %v371_v7 = vand.u32 4294901760, %v1860_v1 }
  0xb1   :  { %1485 = vmatprep.subr.bf16.mxu1 %v1862_v2  ;;  %v365_v13 = vand.u32 4294901760, %v1864_v3  ;;  %v1500_v46 = vpack.c.bf16 %v1864_v3, %v1840_v50 }
  0xb2   :  { %1487 = vmatpush1.bf16.msra.mxu1 %v1858_v0  ;;  %v372_v15 = vsub.f32 %v1860_v1, %v371_v7  ;;  %v1518_v27 = vpack.c.bf16 %v371_v7, %v359_v57 }
  0xb3   :  { %1576 = vmatprep.subr.bf16.mxu1 %v1488_v49  ;;  %v366_v16 = vsub.f32 %v1864_v3, %v365_v13  ;;  %v1502_v49 = vpack.c.bf16 %v1860_v1, %v1838_v48  ;;  %v1516_v25 = vpack.c.bf16 %v365_v13, %v353_v61  ;;  %v908_v1 = vld [vmem:[%s2040_s5] sm:$0x7]  ;;  %s1711_s5 = smov [#allocation2]  }
  0xb4   :  { %v373_v23 = vand.u32 4294901760, %v372_v15  ;;  %v916_v8 = vsel %vm197_vm0, %v908_v1, 0  ;;  %s1472_s10 = sshll.u32 %s1711_s5, 4  ;;  %s1473_s10 = int_to_ptr.vmem [resolvable:$true] %s1472_s10 }
  0xb5   :  { %288 = vmatmul.mubr.f32.vlgmr.msra.gmra.mrb[0].mxu1 %v287_v9  ;;  %v367_v31 = vand.u32 4294901760, %v366_v16  ;;  %s1684_s11 = scalar_lea.vmem %s1473_s10, 128  ;;  %p1689_p1 = scmp.lt.s32.totalorder %s1473_s10, %s1473_s10 }
  0xb6   :  { %1578 = vmatpush1.bf16.msra.mxu1 %v1490_v47  ;;  %v1494_v34 = vpack.c.bf16 %v373_v23, %v361_v22  ;;  %293 = vmatprep.mubr.f32.mxu1 %v1710_v10  ;;  %v320_v47 = vand.u32 4294901760, %v319_v44  ;;  %p1685_p0 = scmp.ne.s32.totalorder %s1473_s10, %s1684_s11  ;;  %p1690_p2 = scmp.lt.s32.totalorder %s1684_s11, %s1684_s11 }
  0xb7   :  { %v1492_v36 = vpack.c.bf16 %v367_v31, %v355_v24 }
  0xb8   :  { %p1691_p3 = por %p1690_p2, %p1689_p1 }
  0xb9   :  { %1493 = vmatprep.subr.bf16.mxu0 %v1492_v36  ;;  %1577 = vmatprep.subr.bf16.mxu1 %v1492_v36 }
  0xba   :  { %1495 = vmatpush1.bf16.msra.mxu0 %v1494_v34  ;;  %1579 = vmatpush1.bf16.msra.mxu1 %v1494_v34  ;;  %p1692_p4 = pnand %p1691_p3, %p1685_p0 }
  0xbb   :  { %1497 = vmatprep.subr.bf16.mxu0 %v1496_v40  ;;  %299 = vmatmul.mubr.f32.gmra.mrb[2].mxu1 %v298_v38 }
  0xbc   :  { %304 = vmatprep.mubr.f32.mxu1 %v1710_v10 }
  0xbd   :  { %433 = vmatmul.mubr.f32.vlgmr.msra.gmra.mrb[0].mxu0 %v1814_v30 }
  0xbe   :  { %1499 = vmatpush1.bf16.msra.mxu0 %v1498_v45  ;;  %438 = vmatprep.mubr.f32.mxu0 %v1710_v10 }
  0xbf   :  { %1501 = vmatprep.subr.bf16.mxu0 %v1500_v46  ;;  %310 = vmatmul.mubr.f32.gmra.mrb[4].mxu1 %v309_v43 }
  0xc0   :  { %315 = vmatprep.mubr.f32.mxu1 %v1710_v10 }
  0xc1   :  { %440 = vmatmul.mubr.f32.gmra.mrb[2].mxu0 %v1853_v62 }
  0xc2   :  { %1503 = vmatpush1.bf16.msra.mxu0 %v1502_v49  ;;  %540 = vmatprep.mubr.f32.mxu0 %v1710_v10 }
  0xc3   :  { %1505 = vmatprep.subr.bf16.mxu0 %v1810_v28  ;;  %321 = vmatmul.mubr.f32.gmra.mrb[6].mxu1 %v320_v47 }
  0xc4   :  { %445 = vmatprep.mubr.f32.mxu1 %v1710_v10 }
  0xc5   :  { %543 = vmatmul.mubr.f32.vlgmr.msra.gmra.mrb[0].mxu0 %v1833_v41  ;;  %v180_v41 = vpop.permute.xlu1 %179 }
  0xc6   :  { %1507 = vmatpush1.bf16.msra.mxu0 %v1806_v26  ;;  %548 = vmatprep.mubr.f32.mxu0 %v1710_v10 }
  0xc7   :  { %1509 = vmatprep.subr.bf16.mxu0 %v1862_v2  ;;  %447 = vmatmul.mubr.f32.vlgmr.msra.gmra.mrb[4].mxu1 %v1869_v5 }
  0xc8   :  { %452 = vmatprep.mubr.f32.mxu1 %v1710_v10 }
  0xc9   :  { %551 = vmatmul.mubr.f32.gmra.mrb[2].mxu0 %v1867_v4  ;;  %v190_v56 = vpop.permute.xlu1 %189 }
  0xca   :  { %1511 = vmatpush1.bf16.msra.mxu0 %v1858_v0  ;;  %556 = vmatprep.mubr.f32.mxu0 %v1710_v10 }
  0xcb   :  { %1513 = vmatprep.subr.bf16.mxu0 %v1512_v52  ;;  %454 = vmatmul.mubr.f32.gmra.mrb[6].mxu1 %v1892_v19 }
  0xcc   :  { %990 = vmatprep.mubr.f32.mxu1 %v1710_v10 }
  0xcd   :  { %559 = vmatmul.mubr.f32.gmra.mrb[4].mxu0 %v1890_v18  ;;  %v195_v3 = vpop.permute.xlu1 %194  ;;  %v1978_v18 = vand.u32 4294901760, %v916_v8 }
  0xce   :  { %564 = vmatprep.mubr.f32.mxu0 %v1710_v10 }
  0xcf   :  { %v1985_v34 = vsub.f32 %v916_v8, %v1978_v18 }
  0xd1   :  { %567 = vmatmul.mubr.f32.gmra.mrb[6].mxu0 %v317_v37  ;;  %v993_v47 = vand.u32 4294901760, %v1985_v34 }
  0xd2   :  { %645 = vmatprep.mubr.f32.mxu0 %v1710_v10 }
  0xd5   :  { %649 = vmatmul.mubr.f32.vlgmr.msra.gmra.mrb[0].mxu0 %v285_v51  ;;  %v185_v51 = vpop.permute.xlu0 %184 }
  0xd6   :  { %1515 = vmatpush1.bf16.msra.mxu0 %v1514_v17  ;;  %654 = vmatprep.mubr.f32.mxu0 %v1710_v10 }
  0xd7   :  { %1517 = vmatprep.subr.bf16.mxu0 %v1516_v25 }
  0xd9   :  { %658 = vmatmul.mubr.f32.gmra.mrb[2].mxu0 %v296_v14 }
  0xda   :  { %1519 = vmatpush1.bf16.msra.mxu0 %v1518_v27  ;;  %663 = vmatprep.mubr.f32.mxu0 %v1710_v10 }
  0xdb   :  { %1521 = vmatprep.subr.bf16.mxu0 %v1810_v28 }
  0xdd   :  { %667 = vmatmul.mubr.f32.gmra.mrb[4].mxu0 %v307_v33 }
  0xde   :  { %672 = vmatprep.mubr.f32.mxu0 %v1710_v10 }
  0xe1   :  { %676 = vmatmul.mubr.f32.gmra.mrb[6].mxu0 %v318_v42 }
  0xe2   :  { %770 = vmatprep.mubr.f32.mxu0 %v1710_v10 }
  0xe5   :  { %772 = vmatmul.mubr.f32.vlgmr.msra.gmra.mrb[0].mxu0 %v1814_v30 }
  0xe6   :  { %1523 = vmatpush1.bf16.msra.mxu0 %v1806_v26  ;;  %777 = vmatprep.mubr.f32.mxu0 %v1710_v10 }
  0xe7   :  { %1525 = vmatprep.subr.bf16.mxu0 %v1862_v2 }
  0xe9   :  { %779 = vmatmul.mubr.f32.gmra.mrb[2].mxu0 %v1853_v62 }
  0xea   :  { %1527 = vmatpush1.bf16.msra.mxu0 %v1858_v0  ;;  %784 = vmatprep.mubr.f32.mxu0 %v1710_v10 }
  0xed   :  { %786 = vmatmul.mubr.f32.gmra.mrb[4].mxu0 %v1869_v5 }
  0xee   :  { %791 = vmatprep.mubr.f32.mxu0 %v1710_v10 }
  0xf1   :  { %793 = vmatmul.mubr.f32.gmra.mrb[6].mxu0 %v1892_v19 }
  0xf2   :  { %871 = vmatprep.mubr.f32.mxu0 %v1710_v10 }
  0xf5   :  { %873 = vmatmul.mubr.f32.vlgmr.msra.gmra.mrb[0].mxu0 %v1814_v30 }
  0xf6   :  { %878 = vmatprep.mubr.f32.mxu0 %v1710_v10 }
  0xf9   :  { %880 = vmatmul.mubr.f32.gmra.mrb[2].mxu0 %v1853_v62 }
  0xfa   :  { %885 = vmatprep.mubr.f32.mxu0 %v1710_v10 }
  0xfd   :  { %887 = vmatmul.mubr.f32.gmra.mrb[4].mxu0 %v1869_v5 }
  0xfe   :  { %892 = vmatprep.mubr.f32.mxu0 %v1710_v10 }
 0x101   :  { %894 = vmatmul.mubr.f32.gmra.mrb[6].mxu0 %v1892_v19 }
 0x188   :  { %v289_v12 = vpop.f32.mrb[0].mxu1 }
 0x189   :  { %v291_v20 = vpop.f32.mrb[1].mxu1  ;;  %v290_v48 = vadd.f32 %v289_v12, %v180_v41 }
 0x18a   :  { %v292_v50 = vadd.f32 %v291_v20, %v180_v41 }
 0x18e   :  { %v300_v26 = vpop.f32.mrb[2].mxu1 }
 0x18f   :  { %v302_v28 = vpop.f32.mrb[3].mxu1  ;;  %v301_v58 = vadd.f32 %v300_v26, %v185_v51 }
 0x190   :  { %v303_v59 = vadd.f32 %v302_v28, %v185_v51 }
 0x19a   :  { %v448_v29 = vpop.f32.mrb[4].mxu1 }
 0x19b   :  { %v450_v32 = vpop.f32.mrb[5].mxu1  ;;  %v1588_v0 = vadd.f32 %v448_v29, %v190_v56 }
 0x19c   :  { %v1590_v2 = vadd.f32 %v450_v32, %v190_v56 }
 0x19e   :  { %v455_v35 = vpop.f32.mrb[6].mxu1 }
 0x19f   :  { %v457_v30 = vpop.f32.mrb[7].mxu1  ;;  %v1592_v9 = vadd.f32 %v455_v35, %v195_v3 }
 0x1a0   :  { %v1594_v11 = vadd.f32 %v457_v30, %v195_v3 }
 0x1c8   :  { %v874_v53 = vpop.f32.mrb[0].mxu0 }
 0x1c9   :  { %v1581_v54 = vadd.f32 %v874_v53, %v290_v48  ;;  %v876_v55 = vpop.f32.mrb[1].mxu0 }
 0x1ca   :  { %v1583_v57 = vadd.f32 %v876_v55, %v292_v50  ;;  %v994_v50 = vsub.f32 %v1985_v34, %v993_v47 }
 0x1cb   :  { %1668 = vtanh.f32 %v1581_v54 }
 0x1cc   :  { %1670 = vtanh.f32 %v1583_v57  ;;  %v881_v60 = vpop.f32.mrb[2].mxu0 }
 0x1cd   :  { %v1585_v61 = vadd.f32 %v881_v60, %v301_v58  ;;  %v883_v62 = vpop.f32.mrb[3].mxu0 }
 0x1ce   :  { %v1587_v63 = vadd.f32 %v883_v62, %v303_v59 }
 0x1cf   :  { %1672 = vtanh.f32 %v1585_v61 }
 0x1d0   :  { %1674 = vtanh.f32 %v1587_v63  ;;  %v888_v4 = vpop.f32.mrb[4].mxu0 }
 0x1d1   :  { %v1589_v5 = vadd.f32 %v1588_v0, %v888_v4  ;;  %v890_v6 = vpop.f32.mrb[5].mxu0 }
 0x1d2   :  { %v1591_v7 = vadd.f32 %v1590_v2, %v890_v6 }
 0x1d3   :  { %1676 = vtanh.f32 %v1589_v5 }
 0x1d4   :  { %1678 = vtanh.f32 %v1591_v7  ;;  %v895_v13 = vpop.f32.mrb[6].mxu0  ;;  %v995_v7 = vand.u32 4294901760, %v994_v50 }
 0x1d5   :  { %v1669_v14 = vpop.eup %1668  ;;  %v1593_v15 = vadd.f32 %v1592_v9, %v895_v13  ;;  %v897_v16 = vpop.f32.mrb[7].mxu0 }
 0x1d6   :  { %v1671_v19 = vpop.eup %1670  ;;  %v1595_v21 = vadd.f32 %v1594_v11, %v897_v16  ;;  %v920_v22 = vand.u32 4294901760, %v1669_v14 }
 0x1d7   :  { %1680 = vtanh.f32 %v1593_v15  ;;  %v918_v23 = vand.u32 4294901760, %v1671_v19 }
 0x1d8   :  { %1682 = vtanh.f32 %v1595_v21  ;;  %v1980_v24 = vsub.f32 %v1669_v14, %v920_v22 }
 0x1d9   :  { %v1673_v31 = vpop.eup %1672  ;;  %v1982_v33 = vsub.f32 %v1671_v19, %v918_v23 }
 0x1da   :  { %v1675_v36 = vpop.eup %1674  ;;  %v924_v37 = vand.u32 4294901760, %v1673_v31  ;;  %v1010_v38 = vand.u32 4294901760, %v1980_v24 }
 0x1db   :  { %v922_v39 = vand.u32 4294901760, %v1675_v36  ;;  %v1004_v40 = vand.u32 4294901760, %v1982_v33 }
 0x1dc   :  { %v1989_v42 = vpack.c.bf16 %v924_v37, %v920_v22  ;;  %v1991_v43 = vsub.f32 %v1673_v31, %v924_v37  ;;  %v1011_v17 = vsub.f32 %v1980_v24, %v1010_v38 }
 0x1dd   :  { %v1677_v44 = vpop.eup %1676  ;;  %v1993_v45 = vpack.c.bf16 %v922_v39, %v918_v23  ;;  %v1015_v46 = vsub.f32 %v1675_v36, %v922_v39  ;;  %v1005_v20 = vsub.f32 %v1982_v33, %v1004_v40 }
 0x1de   :  { %v1679_v49 = vpop.eup %1678  ;;  %v928_v52 = vand.u32 4294901760, %v1677_v44  ;;  %v1022_v25 = vand.u32 4294901760, %v1991_v43  ;;  %v1546_v27 = vpack.c.bf16 %v1991_v43, %v1980_v24  ;;  %v1012_v55 = vand.u32 4294901760, %v1011_v17 }
 0x1df   :  { %1529 = vmatprep.subr.bf16.mxu1 %v1993_v45  ;;  %v926_v12 = vand.u32 4294901760, %v1679_v49  ;;  %v1016_v26 = vand.u32 4294901760, %v1015_v46  ;;  %v1544_v28 = vpack.c.bf16 %v1015_v46, %v1982_v33  ;;  %v1006_v59 = vand.u32 4294901760, %v1005_v20  ;;  %v913_v33 = vpop.permute.xlu0 %912 }
 0x1e0   :  { %1531 = vmatpush1.bf16.msra.mxu1 %v1989_v42  ;;  %v1033_v29 = vsub.f32 %v1677_v44, %v928_v52  ;;  %v1023_v32 = vsub.f32 %v1991_v43, %v1022_v25  ;;  %v1562_v35 = vpack.c.bf16 %v1022_v25, %v1010_v38 }
 0x1e1   :  { %v1681_v30 = vpop.eup %1680  ;;  %v1027_v41 = vsub.f32 %v1679_v49, %v926_v12  ;;  %v1017_v48 = vsub.f32 %v1015_v46, %v1016_v26  ;;  %v1560_v51 = vpack.c.bf16 %v1016_v26, %v1004_v40 }
 0x1e2   :  { %v1683_v53 = vpop.eup %1682  ;;  %v932_v54 = vand.u32 4294901760, %v1681_v30  ;;  %v1024_v56 = vand.u32 4294901760, %v1023_v32  ;;  %v1034_v57 = vand.u32 4294901760, %v1033_v29 }
 0x1e3   :  { %v930_v58 = vand.u32 4294901760, %v1683_v53  ;;  %v1018_v60 = vand.u32 4294901760, %v1017_v48  ;;  %v1028_v61 = vand.u32 4294901760, %v1027_v41 }
 0x1e4   :  { %v1534_v62 = vpack.c.bf16 %v932_v54, %v928_v52  ;;  %v1045_v63 = vsub.f32 %v1681_v30, %v932_v54  ;;  %v1538_v0 = vpack.c.bf16 %v1024_v56, %v1012_v55  ;;  %v1035_v4 = vsub.f32 %v1033_v29, %v1034_v57 }
 0x1e5   :  { %v1532_v1 = vpack.c.bf16 %v930_v58, %v926_v12  ;;  %v1039_v2 = vsub.f32 %v1683_v53, %v930_v58  ;;  %v1536_v3 = vpack.c.bf16 %v1018_v60, %v1006_v59  ;;  %v1029_v8 = vsub.f32 %v1027_v41, %v1028_v61 }
 0x1e6   :  { %v1046_v5 = vand.u32 4294901760, %v1045_v63  ;;  %v1550_v6 = vpack.c.bf16 %v1045_v63, %v1033_v29  ;;  %v1036_v19 = vand.u32 4294901760, %v1035_v4 }
 0x1e7   :  { %1533 = vmatprep.subr.bf16.mxu1 %v1532_v1  ;;  %v1040_v9 = vand.u32 4294901760, %v1039_v2  ;;  %v1548_v11 = vpack.c.bf16 %v1039_v2, %v1027_v41  ;;  %v1030_v22 = vand.u32 4294901760, %v1029_v8 }
 0x1e8   :  { %1535 = vmatpush1.bf16.msra.mxu1 %v1534_v62  ;;  %v1047_v13 = vsub.f32 %v1045_v63, %v1046_v5  ;;  %v1566_v14 = vpack.c.bf16 %v1046_v5, %v1034_v57 }
 0x1e9   :  { %1537 = vmatprep.subr.bf16.mxu1 %v1536_v3  ;;  %v1041_v15 = vsub.f32 %v1039_v2, %v1040_v9  ;;  %v1564_v16 = vpack.c.bf16 %v1040_v9, %v1028_v61 }
 0x1ea   :  { %v1048_v21 = vand.u32 4294901760, %v1047_v13 }
 0x1eb   :  { %996 = vmatmul.mubr.f32.vlgmr.msra.gmra.mrb[8].mxu1 %v995_v7  ;;  %v1042_v23 = vand.u32 4294901760, %v1041_v15 }
 0x1ec   :  { %1539 = vmatpush1.bf16.msra.mxu1 %v1538_v0  ;;  %v1542_v24 = vpack.c.bf16 %v1048_v21, %v1036_v19  ;;  %1106 = vmatprep.mubr.f32.mxu1 %v1710_v10 }
 0x1ed   :  { %v1540_v31 = vpack.c.bf16 %v1042_v23, %v1030_v22 }
 0x1ef   :  { %1541 = vmatprep.subr.bf16.mxu1 %v1540_v31 }
 0x1f0   :  { %1543 = vmatpush1.bf16.msra.mxu1 %v1542_v24 }
 0x1f1   :  { %1545 = vmatprep.subr.bf16.mxu1 %v1544_v28 }
 0x1f3   :  { %1108 = vmatmul.mubr.f32.vlgmr.msra.gmra.mrb[8].mxu1 %v1978_v18 }
 0x1f4   :  { %1547 = vmatpush1.bf16.msra.mxu1 %v1546_v27  ;;  %1194 = vmatprep.mubr.f32.mxu1 %v1710_v10 }
 0x1f5   :  { %1549 = vmatprep.subr.bf16.mxu1 %v1548_v11 }
 0x1f8   :  { %1551 = vmatpush1.bf16.msra.mxu1 %v1550_v6 }
 0x1f9   :  { %1553 = vmatprep.subr.bf16.mxu1 %v1993_v45 }
 0x1fb   :  { %1197 = vmatmul.mubr.f32.vlgmr.msra.gmra.mrb[8].mxu1 %v1985_v34 }
 0x1fc   :  { %1555 = vmatpush1.bf16.msra.mxu1 %v1989_v42  ;;  %1275 = vmatprep.mubr.f32.mxu1 %v1710_v10 }
 0x1fd   :  { %1557 = vmatprep.subr.bf16.mxu1 %v1532_v1 }
 0x200   :  { %1559 = vmatpush1.bf16.msra.mxu1 %v1534_v62 }
 0x201   :  { %1561 = vmatprep.subr.bf16.mxu1 %v1560_v51 }
 0x203   :  { %1279 = vmatmul.mubr.f32.vlgmr.msra.gmra.mrb[8].mxu1 %v993_v47 }
 0x204   :  { %1563 = vmatpush1.bf16.msra.mxu1 %v1562_v35  ;;  %1373 = vmatprep.mubr.f32.mxu1 %v1710_v10 }
 0x205   :  { %1565 = vmatprep.subr.bf16.mxu1 %v1564_v16 }
 0x208   :  { %1567 = vmatpush1.bf16.msra.mxu1 %v1566_v14 }
 0x209   :  { %1569 = vmatprep.subr.bf16.mxu1 %v1993_v45 }
 0x20b   :  { %1375 = vmatmul.mubr.f32.vlgmr.msra.gmra.mrb[8].mxu1 %v1978_v18 }
 0x20c   :  { %1571 = vmatpush1.bf16.msra.mxu1 %v1989_v42  ;;  %1453 = vmatprep.mubr.f32.mxu1 %v1710_v10 }
 0x20d   :  { %1573 = vmatprep.subr.bf16.mxu1 %v1532_v1 }
 0x210   :  { %1575 = vmatpush1.bf16.msra.mxu1 %v1534_v62 }
 0x213   :  { %1455 = vmatmul.mubr.f32.vlgmr.msra.gmra.mrb[8].mxu1 %v1978_v18 }
 0x2e6   :  { %v1456_v34 = vpop.f32.mrb[8].mxu1 }
 0x2e7   :  { %v1596_v36 = vadd.f32 %v1456_v34, %v913_v33  ;;  %v1458_v37 = vpop.f32.mrb[9].mxu1 }
 0x2e8   :  { %v1597_v38 = vadd.f32 %v1458_v37, %v913_v33 }
 0x2ea   :  { %v1463_v39 = vcombine.low %v1596_v36, %v1597_v38 }
 0x2ec   :  { %1465 = vst [vmem:[#allocation2] sm:$0x77] %v1463_v39 }
 0x2ed   :  { %1695 = shalt.err (!%p1692_p4)
}
 0x2ee   :  { %s1696_s14 = scalar_lea.hbm %s2042_s7, 128 }
 0x2ef   :  { %p1697_p5 = scmp.ne.s32.totalorder %s2042_s7, %s1696_s14  ;;  %p1700_p6 = scmp.lt.u32.totalorder %s1696_s14, %s2042_s7 }
 0x2f1   :  { %p1702_p7 = pnand %p1700_p6, %p1697_p5 }
 0x2f3   :  { %1705 = shalt.err (!%p1702_p7)
}
 0x2f4   :  { %1475 = dma.vmem_to_hbm [thread:$0]  %s1473_s10, 128, %s2042_s7, [#allocation3]  }
 0x2f5   :  { %1706 = dma.done.wait [#allocation3], 128  }
 0x2f6   :  { %1707 = vsyncadd [#allocation3], 4294967168 }
 0x2f7   :  { %1479 = vsyncpa [#allocation3], 1 }

</bundles_post_ra>
